<compile_context>
chip_gen: v6e
topology: v6e:2x2x1
jax: 0.10.0
libtpu: 0.0.40
codegen_flags: <defaults>
</compile_context>

<pallas_src>
import functools

import jax
import jax.numpy as jnp
from jax.experimental import pallas as pl
from jax.experimental.pallas import tpu as pltpu


def _gelu(x):
    # tanh-approximate GELU (TPU EUP-friendly).
    # TODO(synk): torch nn.GELU defaults to the exact erf form; swap to
    # jax.nn.gelu(x, approximate=False) if bit-exact GELU matching is required.
    return jax.nn.gelu(x, approximate=True)


def _combo_kernel(
    x_ref,                     # (B_pad, D_in)            bf16
    wbb_ref, bbb_ref,          # (D_in, E) bf16, (1, E) f32   shared backbone
    w1_ref, b1_ref,            # (E, 2H) bf16, (1, 2H) f32    teacher||student concat
    w2_ref, b2_ref,            # (2, H, BN) bf16, (2, 1, BN) f32
    w3_ref,                    # (2, BN, TILE_N) bf16         current output tile
    out_ref,                   # (2, B_pad, TILE_N) f32       current output tile
    hn_ref,                    # (2, B_pad, BN) bf16 scratch  (persists across tiles)
):
    hid = w2_ref.shape[1]

    # Shared trunk (backbone embed + both heads' MLP up to the L2-normalized
    # bottleneck) runs once, at output-tile 0, and is cached in VMEM scratch
    # for every subsequent w3 tile.
    @pl.when(pl.program_id(0) == 0)
    def _():
        embed = (
            jnp.dot(x_ref[...], wbb_ref[...], preferred_element_type=jnp.float32)
            + bbb_ref[...]
        )
        # Layer 1: teacher||student concatenated along N -> single 256-wide
        # MXU push on v6e/v7x.
        h1 = _gelu(
            jnp.dot(embed.astype(jnp.bfloat16), w1_ref[...],
                    preferred_element_type=jnp.float32)
            + b1_ref[...]
        ).astype(jnp.bfloat16)

        for head in range(2):              # 0 = teacher, 1 = student (unrolled)
            hh = h1[:, head * hid:(head + 1) * hid]
            h2 = _gelu(
                jnp.dot(hh, w2_ref[head], preferred_element_type=jnp.float32)
                + b2_ref[head]
            )
            # L2 normalize along the feature axis (DINO-head style), f32 VPU.
            inv = jax.lax.rsqrt(jnp.sum(h2 * h2, axis=-1, keepdims=True) + 1e-12)
            hn_ref[head] = (h2 * inv).astype(jnp.bfloat16)

    # Final projection, streamed over output tiles (weight-streaming loop at
    # real TEMI head sizes; a single tile at the toy size here).
    for head in range(2):
        out_ref[head] = jnp.dot(hn_ref[head], w3_ref[head],
                                preferred_element_type=jnp.float32)


def prepare_params(backbone_params, teacher_head, student_head):
    """One-time parameter prep (cast / concat / stack / pad).

    Hoisted out of the per-forward path so the forward only touches the
    images (per review: avoid re-copying the whole parameter set every call).
    """
    wbb, bbb = backbone_params
    tw1, tb1, tw2, tb2, tw3 = teacher_head
    sw1, sb1, sw2, sb2, sw3 = student_head

    out_dim = tw3.shape[1]
    out_pad = int(pl.cdiv(out_dim, 128)) * 128

    wbb_b = jnp.asarray(wbb, jnp.bfloat16)
    bbb_f = jnp.asarray(bbb, jnp.float32).reshape(1, -1)

    # Teacher & student layer-1 weights concatenated along the output dim.
    w1c = jnp.concatenate([tw1, sw1], axis=1).astype(jnp.bfloat16)        # (E, 2H)
    b1c = jnp.concatenate(
        [jnp.asarray(tb1, jnp.float32).reshape(1, -1),
         jnp.asarray(sb1, jnp.float32).reshape(1, -1)], axis=1)           # (1, 2H)

    w2s = jnp.stack([tw2, sw2]).astype(jnp.bfloat16)                      # (2, H, BN)
    b2s = jnp.stack([jnp.asarray(tb2, jnp.float32).reshape(1, -1),
                     jnp.asarray(sb2, jnp.float32).reshape(1, -1)])       # (2, 1, BN)

    # Zero-pad the logit columns to a 128-lane multiple (sliced off in the
    # wrapper). TODO(synk): at real out_dim (already a multiple of 128) this
    # pad is a no-op; consider bf16 logits if the downstream loss allows it.
    w3s = jnp.pad(jnp.stack([tw3, sw3]),
                  ((0, 0), (0, 0), (0, out_pad - out_dim))).astype(jnp.bfloat16)

    return (wbb_b, bbb_f, w1c, b1c, w2s, b2s, w3s), out_dim


@functools.partial(jax.jit, static_argnames=("out_dim",))
def teacher_student_forward(images, prepped, *, out_dim):
    """Forward pass of TeacherStudentCombo (train_backbone=False branch)."""
    wbb, bbb, w1, b1, w2, b2, w3 = prepped

    n = images.shape[0]
    x = images.reshape(n, -1).astype(jnp.bfloat16)
    d_in = x.shape[1]

    # Pad the batch to a multiple of 16 (bf16 packs 2 rows per sublane).
    b_pad = int(pl.cdiv(n, 16)) * 16
    x_pad = jnp.pad(x, ((0, b_pad - n), (0, 0)))

    e = wbb.shape[1]
    two_h = w1.shape[1]
    hid = two_h // 2
    bn = w2.shape[2]
    out_pad = w3.shape[2]

    # Tile the output dim so a double-buffered w3 tile always fits VMEM
    # (needed at real TEMI head sizes, esp. v7x's 64 MiB VMEM); at the toy
    # size this is a single tile.
    if out_pad <= 1024:
        tile_n = out_pad
    else:
        tile_n = next(t for t in (1024, 512, 256, 128) if out_pad % t == 0)
    num_tiles = out_pad // tile_n

    # Scoped-VMEM estimate (x2 headroom covers double buffering).
    vmem_est = (
        x_pad.size * 2 + wbb.size * 2 + bbb.size * 4 + w1.size * 2 + b1.size * 4
        + w2.size * 2 + b2.size * 4
        + 2 * (2 * bn * tile_n * 2)        # w3 tile (bf16, double-buffered)
        + 2 * (2 * b_pad * tile_n * 4)     # out tile (f32, double-buffered)
        + 2 * b_pad * bn * 2               # hn scratch (bf16)
    )
    vmem_limit = int(min(100 * 2**20, max(2 * vmem_est, 32 * 2**20)))

    shared2 = lambda j: (0, 0)     # same block every tile -> fetched once
    shared3 = lambda j: (0, 0, 0)
    tiled3 = lambda j: (0, 0, j)   # walk the output-dim tiles

    out = pl.pallas_call(
        _combo_kernel,
        grid=(num_tiles,),
        in_specs=[
            pl.BlockSpec((b_pad, d_in), shared2),
            pl.BlockSpec((d_in, e), shared2),
            pl.BlockSpec((1, e), shared2),
            pl.BlockSpec((e, two_h), shared2),
            pl.BlockSpec((1, two_h), shared2),
            pl.BlockSpec((2, hid, bn), shared3),
            pl.BlockSpec((2, 1, bn), shared3),
            pl.BlockSpec((2, bn, tile_n), tiled3),
        ],
        out_specs=pl.BlockSpec((2, b_pad, tile_n), tiled3),
        out_shape=jax.ShapeDtypeStruct((2, b_pad, out_pad), jnp.float32),
        scratch_shapes=[pltpu.VMEM((2, b_pad, bn), jnp.bfloat16)],
        compiler_params=pltpu.CompilerParams(
            # Output tiles reuse the hn scratch written at tile 0, so this
            # axis is a carried loop ("arbitrary"), not a parallel one.
            dimension_semantics=("arbitrary",),
            vmem_limit_bytes=vmem_limit,
        ),
    )(x_pad, wbb, bbb, w1, b1, w2, b2, w3)

    t_out = out[0, :n, :out_dim]
    s_out = out[1, :n, :out_dim]
    return t_out, s_out


def init_params(key, in_dim, embed_dim, hidden_dim, bottleneck_dim, out_dim):
    """Deterministic student init; teacher = copy of student (load_state_dict)."""
    ks = jax.random.split(key, 6)

    def lin(k, fan_in, fan_out):
        scale = 1.0 / jnp.sqrt(jnp.float32(fan_in))
        return jax.random.uniform(
            k, (fan_in, fan_out), jnp.float32, -scale, scale
        )

    # Backbone (shared: student.backbone = teacher.backbone when not train_backbone).
    wbb = lin(ks[0], in_dim, embed_dim)
    bbb = jnp.zeros((1, embed_dim), jnp.float32)
    backbone = (wbb, bbb)

    # Student head.
    w1 = lin(ks[1], embed_dim, hidden_dim)
    b1 = jnp.zeros((1, hidden_dim), jnp.float32)
    w2 = lin(ks[2], hidden_dim, bottleneck_dim)
    b2 = jnp.zeros((1, bottleneck_dim), jnp.float32)
    w3 = lin(ks[3], bottleneck_dim, out_dim)
    student_head = (w1, b1, w2, b2, w3)

    # teacher.load_state_dict(student.state_dict()) -> identical copy.
    teacher_head = tuple(jnp.array(p) for p in student_head)
    return backbone, teacher_head, student_head


if __name__ == "__main__":
    # Small shapes: images NCHW = (2, 4, 16, 16) -> flattened in_dim = 1024.
    # Head dims chosen MXU/lane-friendly (multiples of 128); OUT_DIM stays 32
    # and is padded to 128 inside the kernel, sliced back on the host.
    B, C, H, W = 2, 4, 16, 16
    IN_DIM = C * H * W
    EMBED_DIM, HIDDEN_DIM, BOTTLENECK_DIM, OUT_DIM = 128, 128, 128, 32

    key = jax.random.PRNGKey(0)
    k_img, k_par = jax.random.split(key)
    images = jax.random.normal(k_img, (B, C, H, W), jnp.float32)

    backbone, teacher_head, student_head = init_params(
        k_par, IN_DIM, EMBED_DIM, HIDDEN_DIM, BOTTLENECK_DIM, OUT_DIM
    )

    # One-time weight prep (cast / concat / stack / pad) — NOT per forward.
    prepped, out_dim = prepare_params(backbone, teacher_head, student_head)
    prepped = jax.block_until_ready(prepped)

    teacher_out, student_out = teacher_student_forward(
        images, prepped, out_dim=out_dim
    )
    jax.block_until_ready((teacher_out, student_out))

    # Pure-JAX reference using the same bf16-operand / f32-accumulate recipe.
    def ref_forward(images):
        x = images.reshape(images.shape[0], -1).astype(jnp.bfloat16)
        wbb, bbb = backbone
        embed = jnp.dot(x, wbb.astype(jnp.bfloat16),
                        preferred_element_type=jnp.float32) + bbb

        def head(params):
            w1, b1, w2, b2, w3 = params
            h = jax.nn.gelu(
                jnp.dot(embed.astype(jnp.bfloat16), w1.astype(jnp.bfloat16),
                        preferred_element_type=jnp.float32) + b1,
                approximate=True)
            h = jax.nn.gelu(
                jnp.dot(h.astype(jnp.bfloat16), w2.astype(jnp.bfloat16),
                        preferred_element_type=jnp.float32) + b2,
                approximate=True)
            hn = h * jax.lax.rsqrt(jnp.sum(h * h, -1, keepdims=True) + 1e-12)
            return jnp.dot(hn.astype(jnp.bfloat16), w3.astype(jnp.bfloat16),
                           preferred_element_type=jnp.float32)

        return head(teacher_head), head(student_head)

    ref_t, ref_s = ref_forward(images)
    assert teacher_out.shape == (B, OUT_DIM) and student_out.shape == (B, OUT_DIM)
    assert jnp.allclose(teacher_out, ref_t, atol=2e-3, rtol=2e-3)
    assert jnp.allclose(student_out, ref_s, atol=2e-3, rtol=2e-3)
    # teacher was initialized from student's state_dict -> identical outputs.
    assert jnp.allclose(teacher_out, student_out, atol=1e-6)

    print("KERNEL_OK")
</pallas_src>

<mosaic_0001>
module attributes {stable_mosaic.version = 11 : i64} {
  func.func @_combo_kernel(%arg0: i32, %arg1: memref<16x1024xbf16, #tpu.memory_space<vmem>>, %arg2: memref<1024x128xbf16, #tpu.memory_space<vmem>>, %arg3: memref<1x128xf32, #tpu.memory_space<vmem>>, %arg4: memref<128x256xbf16, #tpu.memory_space<vmem>>, %arg5: memref<1x256xf32, #tpu.memory_space<vmem>>, %arg6: memref<2x128x128xbf16, #tpu.memory_space<vmem>>, %arg7: memref<2x1x128xf32, #tpu.memory_space<vmem>>, %arg8: memref<2x128x128xbf16, #tpu.memory_space<vmem>>, %arg9: memref<2x16x128xf32, #tpu.memory_space<vmem>>, %arg10: memref<2x16x128xbf16, #tpu.memory_space<vmem>>) attributes {dimension_semantics = [#tpu.dimension_semantics<arbitrary>], iteration_bounds = array<i64: 1>, scalar_prefetch = 0 : i64, scratch_operands = 1 : i64, tpu.core_type = #tpu.core_type<tc>, window_params = [{pipeline_mode = #tpu.pipeline_mode<synchronous>, transform_indices = @transform_0, window_bounds = array<i64: 16, 1024>}, {pipeline_mode = #tpu.pipeline_mode<synchronous>, transform_indices = @transform_1, window_bounds = array<i64: 1024, 128>}, {pipeline_mode = #tpu.pipeline_mode<synchronous>, transform_indices = @transform_2, window_bounds = array<i64: 1, 128>}, {pipeline_mode = #tpu.pipeline_mode<synchronous>, transform_indices = @transform_3, window_bounds = array<i64: 128, 256>}, {pipeline_mode = #tpu.pipeline_mode<synchronous>, transform_indices = @transform_4, window_bounds = array<i64: 1, 256>}, {pipeline_mode = #tpu.pipeline_mode<synchronous>, transform_indices = @transform_5, window_bounds = array<i64: 2, 128, 128>}, {pipeline_mode = #tpu.pipeline_mode<synchronous>, transform_indices = @transform_6, window_bounds = array<i64: 2, 1, 128>}, {transform_indices = @transform_7, window_bounds = array<i64: 2, 128, 128>}, {transform_indices = @transform_8, window_bounds = array<i64: 2, 16, 128>}]} {
    %c0_i32 = arith.constant 0 : i32
    %0 = arith.cmpi eq, %arg0, %c0_i32 : i32
    %1 = arith.extui %0 : i1 to i32
    %c0_i32_0 = arith.constant 0 : i32
    %2 = arith.cmpi ne, %1, %c0_i32_0 : i32
    scf.if %2 {
      %c0_18 = arith.constant 0 : index
      %c0_19 = arith.constant 0 : index
      %19 = vector.load %arg1[%c0_18, %c0_19] : memref<16x1024xbf16, #tpu.memory_space<vmem>>, vector<16x1024xbf16>
      %c0_20 = arith.constant 0 : index
      %c0_21 = arith.constant 0 : index
      %20 = vector.load %arg2[%c0_20, %c0_21] : memref<1024x128xbf16, #tpu.memory_space<vmem>>, vector<1024x128xbf16>
      %cst_22 = arith.constant dense<0.000000e+00> : vector<16x128xf32>
      %21 = tpu.matmul %19, %20, %cst_22 {dimension_numbers = #tpu.dot_dimension_numbers<[1], [0], [0], [1], [0, 0, 1, 1], [], []>} : vector<16x1024xbf16>, vector<1024x128xbf16>, vector<16x128xf32> -> vector<16x128xf32>
      %c0_23 = arith.constant 0 : index
      %c0_24 = arith.constant 0 : index
      %22 = vector.load %arg3[%c0_23, %c0_24] : memref<1x128xf32, #tpu.memory_space<vmem>>, vector<1x128xf32>
      %23 = vector.broadcast %22 : vector<1x128xf32> to vector<16x128xf32>
      %24 = arith.addf %21, %23 : vector<16x128xf32>
      %25 = arith.truncf %24 : vector<16x128xf32> to vector<16x128xbf16>
      %c0_25 = arith.constant 0 : index
      %c0_26 = arith.constant 0 : index
      %26 = vector.load %arg4[%c0_25, %c0_26] : memref<128x256xbf16, #tpu.memory_space<vmem>>, vector<128x256xbf16>
      %cst_27 = arith.constant dense<0.000000e+00> : vector<16x256xf32>
      %27 = tpu.matmul %25, %26, %cst_27 {dimension_numbers = #tpu.dot_dimension_numbers<[1], [0], [0], [1], [0, 0, 1, 1], [], []>} : vector<16x128xbf16>, vector<128x256xbf16>, vector<16x256xf32> -> vector<16x256xf32>
      %c0_28 = arith.constant 0 : index
      %c0_29 = arith.constant 0 : index
      %28 = vector.load %arg5[%c0_28, %c0_29] : memref<1x256xf32, #tpu.memory_space<vmem>>, vector<1x256xf32>
      %29 = vector.broadcast %28 : vector<1x256xf32> to vector<16x256xf32>
      %30 = arith.addf %27, %29 : vector<16x256xf32>
      %31 = arith.mulf %30, %30 : vector<16x256xf32>
      %32 = arith.mulf %30, %31 : vector<16x256xf32>
      %cst_30 = arith.constant 4.471500e-02 : f32
      %33 = vector.broadcast %cst_30 : f32 to vector<16x256xf32>
      %34 = arith.mulf %33, %32 : vector<16x256xf32>
      %35 = arith.addf %30, %34 : vector<16x256xf32>
      %cst_31 = arith.constant 0.797884583 : f32
      %36 = vector.broadcast %cst_31 : f32 to vector<16x256xf32>
      %37 = arith.mulf %36, %35 : vector<16x256xf32>
      %38 = math.tanh %37 : vector<16x256xf32>
      %cst_32 = arith.constant 1.000000e+00 : f32
      %39 = vector.broadcast %cst_32 : f32 to vector<16x256xf32>
      %40 = arith.addf %39, %38 : vector<16x256xf32>
      %cst_33 = arith.constant 5.000000e-01 : f32
      %41 = vector.broadcast %cst_33 : f32 to vector<16x256xf32>
      %42 = arith.mulf %41, %40 : vector<16x256xf32>
      %43 = arith.mulf %30, %42 : vector<16x256xf32>
      %44 = arith.truncf %43 : vector<16x256xf32> to vector<16x256xbf16>
      %45 = vector.extract_strided_slice %44 {offsets = [0, 0], sizes = [16, 128], strides = [1, 1]} : vector<16x256xbf16> to vector<16x128xbf16>
      %c0_34 = arith.constant 0 : index
      %c0_35 = arith.constant 0 : index
      %c0_36 = arith.constant 0 : index
      %46 = vector.load %arg6[%c0_34, %c0_35, %c0_36] : memref<2x128x128xbf16, #tpu.memory_space<vmem>>, vector<1x128x128xbf16>
      %47 = vector.shape_cast %46 : vector<1x128x128xbf16> to vector<128x128xbf16>
      %cst_37 = arith.constant dense<0.000000e+00> : vector<16x128xf32>
      %48 = tpu.matmul %45, %47, %cst_37 {dimension_numbers = #tpu.dot_dimension_numbers<[1], [0], [0], [1], [0, 0, 1, 1], [], []>} : vector<16x128xbf16>, vector<128x128xbf16>, vector<16x128xf32> -> vector<16x128xf32>
      %c0_38 = arith.constant 0 : index
      %c0_39 = arith.constant 0 : index
      %c0_40 = arith.constant 0 : index
      %49 = vector.load %arg7[%c0_38, %c0_39, %c0_40] : memref<2x1x128xf32, #tpu.memory_space<vmem>>, vector<1x1x128xf32>
      %50 = vector.shape_cast %49 : vector<1x1x128xf32> to vector<1x128xf32>
      %51 = vector.broadcast %50 : vector<1x128xf32> to vector<16x128xf32>
      %52 = arith.addf %48, %51 : vector<16x128xf32>
      %53 = arith.mulf %52, %52 : vector<16x128xf32>
      %54 = arith.mulf %52, %53 : vector<16x128xf32>
      %cst_41 = arith.constant 4.471500e-02 : f32
      %55 = vector.broadcast %cst_41 : f32 to vector<16x128xf32>
      %56 = arith.mulf %55, %54 : vector<16x128xf32>
      %57 = arith.addf %52, %56 : vector<16x128xf32>
      %cst_42 = arith.constant 0.797884583 : f32
      %58 = vector.broadcast %cst_42 : f32 to vector<16x128xf32>
      %59 = arith.mulf %58, %57 : vector<16x128xf32>
      %60 = math.tanh %59 : vector<16x128xf32>
      %cst_43 = arith.constant 1.000000e+00 : f32
      %61 = vector.broadcast %cst_43 : f32 to vector<16x128xf32>
      %62 = arith.addf %61, %60 : vector<16x128xf32>
      %cst_44 = arith.constant 5.000000e-01 : f32
      %63 = vector.broadcast %cst_44 : f32 to vector<16x128xf32>
      %64 = arith.mulf %63, %62 : vector<16x128xf32>
      %65 = arith.mulf %52, %64 : vector<16x128xf32>
      %66 = arith.mulf %65, %65 : vector<16x128xf32>
      %cst_45 = arith.constant dense<0.000000e+00> : vector<16xf32>
      %67 = vector.multi_reduction <add>, %66, %cst_45 [1] : vector<16x128xf32> to vector<16xf32>
      %68 = vector.shape_cast %67 : vector<16xf32> to vector<16x1xf32>
      %cst_46 = arith.constant 9.99999996E-13 : f32
      %69 = vector.broadcast %cst_46 : f32 to vector<16x1xf32>
      %70 = arith.addf %68, %69 : vector<16x1xf32>
      %71 = math.rsqrt %70 : vector<16x1xf32>
      %72 = vector.broadcast %71 : vector<16x1xf32> to vector<16x128xf32>
      %73 = arith.mulf %65, %72 : vector<16x128xf32>
      %74 = arith.truncf %73 : vector<16x128xf32> to vector<16x128xbf16>
      %c0_47 = arith.constant 0 : index
      %c0_48 = arith.constant 0 : index
      %c0_49 = arith.constant 0 : index
      %75 = vector.load %arg10[%c0_47, %c0_48, %c0_49] : memref<2x16x128xbf16, #tpu.memory_space<vmem>>, vector<1x16x128xbf16>
      %76 = vector.shape_cast %75 : vector<1x16x128xbf16> to vector<16x128xbf16>
      %77 = vector.shape_cast %74 : vector<16x128xbf16> to vector<1x16x128xbf16>
      tpu.vector_store %arg10[%c0_47, %c0_48, %c0_49], %77 {strides = array<i32>} : memref<2x16x128xbf16, #tpu.memory_space<vmem>>, vector<1x16x128xbf16>,
      %78 = vector.extract_strided_slice %44 {offsets = [0, 128], sizes = [16, 128], strides = [1, 1]} : vector<16x256xbf16> to vector<16x128xbf16>
      %c1_50 = arith.constant 1 : index
      %c0_51 = arith.constant 0 : index
      %c0_52 = arith.constant 0 : index
      %79 = vector.load %arg6[%c1_50, %c0_51, %c0_52] : memref<2x128x128xbf16, #tpu.memory_space<vmem>>, vector<1x128x128xbf16>
      %80 = vector.shape_cast %79 : vector<1x128x128xbf16> to vector<128x128xbf16>
      %cst_53 = arith.constant dense<0.000000e+00> : vector<16x128xf32>
      %81 = tpu.matmul %78, %80, %cst_53 {dimension_numbers = #tpu.dot_dimension_numbers<[1], [0], [0], [1], [0, 0, 1, 1], [], []>} : vector<16x128xbf16>, vector<128x128xbf16>, vector<16x128xf32> -> vector<16x128xf32>
      %c1_54 = arith.constant 1 : index
      %c0_55 = arith.constant 0 : index
      %c0_56 = arith.constant 0 : index
      %82 = vector.load %arg7[%c1_54, %c0_55, %c0_56] : memref<2x1x128xf32, #tpu.memory_space<vmem>>, vector<1x1x128xf32>
      %83 = vector.shape_cast %82 : vector<1x1x128xf32> to vector<1x128xf32>
      %84 = vector.broadcast %83 : vector<1x128xf32> to vector<16x128xf32>
      %85 = arith.addf %81, %84 : vector<16x128xf32>
      %86 = arith.mulf %85, %85 : vector<16x128xf32>
      %87 = arith.mulf %85, %86 : vector<16x128xf32>
      %cst_57 = arith.constant 4.471500e-02 : f32
      %88 = vector.broadcast %cst_57 : f32 to vector<16x128xf32>
      %89 = arith.mulf %88, %87 : vector<16x128xf32>
      %90 = arith.addf %85, %89 : vector<16x128xf32>
      %cst_58 = arith.constant 0.797884583 : f32
      %91 = vector.broadcast %cst_58 : f32 to vector<16x128xf32>
      %92 = arith.mulf %91, %90 : vector<16x128xf32>
      %93 = math.tanh %92 : vector<16x128xf32>
      %cst_59 = arith.constant 1.000000e+00 : f32
      %94 = vector.broadcast %cst_59 : f32 to vector<16x128xf32>
      %95 = arith.addf %94, %93 : vector<16x128xf32>
      %cst_60 = arith.constant 5.000000e-01 : f32
      %96 = vector.broadcast %cst_60 : f32 to vector<16x128xf32>
      %97 = arith.mulf %96, %95 : vector<16x128xf32>
      %98 = arith.mulf %85, %97 : vector<16x128xf32>
      %99 = arith.mulf %98, %98 : vector<16x128xf32>
      %cst_61 = arith.constant dense<0.000000e+00> : vector<16xf32>
      %100 = vector.multi_reduction <add>, %99, %cst_61 [1] : vector<16x128xf32> to vector<16xf32>
      %101 = vector.shape_cast %100 : vector<16xf32> to vector<16x1xf32>
      %cst_62 = arith.constant 9.99999996E-13 : f32
      %102 = vector.broadcast %cst_62 : f32 to vector<16x1xf32>
      %103 = arith.addf %101, %102 : vector<16x1xf32>
      %104 = math.rsqrt %103 : vector<16x1xf32>
      %105 = vector.broadcast %104 : vector<16x1xf32> to vector<16x128xf32>
      %106 = arith.mulf %98, %105 : vector<16x128xf32>
      %107 = arith.truncf %106 : vector<16x128xf32> to vector<16x128xbf16>
      %c1_63 = arith.constant 1 : index
      %c0_64 = arith.constant 0 : index
      %c0_65 = arith.constant 0 : index
      %108 = vector.load %arg10[%c1_63, %c0_64, %c0_65] : memref<2x16x128xbf16, #tpu.memory_space<vmem>>, vector<1x16x128xbf16>
      %109 = vector.shape_cast %108 : vector<1x16x128xbf16> to vector<16x128xbf16>
      %110 = vector.shape_cast %107 : vector<16x128xbf16> to vector<1x16x128xbf16>
      tpu.vector_store %arg10[%c1_63, %c0_64, %c0_65], %110 {strides = array<i32>} : memref<2x16x128xbf16, #tpu.memory_space<vmem>>, vector<1x16x128xbf16>,
    } else {
    }
    %c0 = arith.constant 0 : index
    %c0_1 = arith.constant 0 : index
    %c0_2 = arith.constant 0 : index
    %3 = vector.load %arg10[%c0, %c0_1, %c0_2] : memref<2x16x128xbf16, #tpu.memory_space<vmem>>, vector<1x16x128xbf16>
    %4 = vector.shape_cast %3 : vector<1x16x128xbf16> to vector<16x128xbf16>
    %c0_3 = arith.constant 0 : index
    %c0_4 = arith.constant 0 : index
    %c0_5 = arith.constant 0 : index
    %5 = vector.load %arg8[%c0_3, %c0_4, %c0_5] : memref<2x128x128xbf16, #tpu.memory_space<vmem>>, vector<1x128x128xbf16>
    %6 = vector.shape_cast %5 : vector<1x128x128xbf16> to vector<128x128xbf16>
    %cst = arith.constant dense<0.000000e+00> : vector<16x128xf32>
    %7 = tpu.matmul %4, %6, %cst {dimension_numbers = #tpu.dot_dimension_numbers<[1], [0], [0], [1], [0, 0, 1, 1], [], []>} : vector<16x128xbf16>, vector<128x128xbf16>, vector<16x128xf32> -> vector<16x128xf32>
    %c0_6 = arith.constant 0 : index
    %c0_7 = arith.constant 0 : index
    %c0_8 = arith.constant 0 : index
    %8 = vector.load %arg9[%c0_6, %c0_7, %c0_8] : memref<2x16x128xf32, #tpu.memory_space<vmem>>, vector<1x16x128xf32>
    %9 = vector.shape_cast %8 : vector<1x16x128xf32> to vector<16x128xf32>
    %10 = vector.shape_cast %7 : vector<16x128xf32> to vector<1x16x128xf32>
    tpu.vector_store %arg9[%c0_6, %c0_7, %c0_8], %10 {strides = array<i32>} : memref<2x16x128xf32, #tpu.memory_space<vmem>>, vector<1x16x128xf32>,
    %c1 = arith.constant 1 : index
    %c0_9 = arith.constant 0 : index
    %c0_10 = arith.constant 0 : index
    %11 = vector.load %arg10[%c1, %c0_9, %c0_10] : memref<2x16x128xbf16, #tpu.memory_space<vmem>>, vector<1x16x128xbf16>
    %12 = vector.shape_cast %11 : vector<1x16x128xbf16> to vector<16x128xbf16>
    %c1_11 = arith.constant 1 : index
    %c0_12 = arith.constant 0 : index
    %c0_13 = arith.constant 0 : index
    %13 = vector.load %arg8[%c1_11, %c0_12, %c0_13] : memref<2x128x128xbf16, #tpu.memory_space<vmem>>, vector<1x128x128xbf16>
    %14 = vector.shape_cast %13 : vector<1x128x128xbf16> to vector<128x128xbf16>
    %cst_14 = arith.constant dense<0.000000e+00> : vector<16x128xf32>
    %15 = tpu.matmul %12, %14, %cst_14 {dimension_numbers = #tpu.dot_dimension_numbers<[1], [0], [0], [1], [0, 0, 1, 1], [], []>} : vector<16x128xbf16>, vector<128x128xbf16>, vector<16x128xf32> -> vector<16x128xf32>
    %c1_15 = arith.constant 1 : index
    %c0_16 = arith.constant 0 : index
    %c0_17 = arith.constant 0 : index
    %16 = vector.load %arg9[%c1_15, %c0_16, %c0_17] : memref<2x16x128xf32, #tpu.memory_space<vmem>>, vector<1x16x128xf32>
    %17 = vector.shape_cast %16 : vector<1x16x128xf32> to vector<16x128xf32>
    %18 = vector.shape_cast %15 : vector<16x128xf32> to vector<1x16x128xf32>
    tpu.vector_store %arg9[%c1_15, %c0_16, %c0_17], %18 {strides = array<i32>} : memref<2x16x128xf32, #tpu.memory_space<vmem>>, vector<1x16x128xf32>,
    return
  }
  func.func @transform_0(%arg0: i32) -> (i32, i32) {
    %c0_i32 = arith.constant 0 : i32
    %c0_i32_0 = arith.constant 0 : i32
    %c0_i32_1 = arith.constant 0 : i32
    return %c0_i32, %c0_i32_0 : i32, i32
  }
  func.func @transform_1(%arg0: i32) -> (i32, i32) {
    %c0_i32 = arith.constant 0 : i32
    %c0_i32_0 = arith.constant 0 : i32
    %c0_i32_1 = arith.constant 0 : i32
    return %c0_i32, %c0_i32_0 : i32, i32
  }
  func.func @transform_2(%arg0: i32) -> (i32, i32) {
    %c0_i32 = arith.constant 0 : i32
    %c0_i32_0 = arith.constant 0 : i32
    %c0_i32_1 = arith.constant 0 : i32
    return %c0_i32, %c0_i32_0 : i32, i32
  }
  func.func @transform_3(%arg0: i32) -> (i32, i32) {
    %c0_i32 = arith.constant 0 : i32
    %c0_i32_0 = arith.constant 0 : i32
    %c0_i32_1 = arith.constant 0 : i32
    return %c0_i32, %c0_i32_0 : i32, i32
  }
  func.func @transform_4(%arg0: i32) -> (i32, i32) {
    %c0_i32 = arith.constant 0 : i32
    %c0_i32_0 = arith.constant 0 : i32
    %c0_i32_1 = arith.constant 0 : i32
    return %c0_i32, %c0_i32_0 : i32, i32
  }
  func.func @transform_5(%arg0: i32) -> (i32, i32, i32) {
    %c0_i32 = arith.constant 0 : i32
    %c0_i32_0 = arith.constant 0 : i32
    %c0_i32_1 = arith.constant 0 : i32
    %c0_i32_2 = arith.constant 0 : i32
    return %c0_i32, %c0_i32_0, %c0_i32_1 : i32, i32, i32
  }
  func.func @transform_6(%arg0: i32) -> (i32, i32, i32) {
    %c0_i32 = arith.constant 0 : i32
    %c0_i32_0 = arith.constant 0 : i32
    %c0_i32_1 = arith.constant 0 : i32
    %c0_i32_2 = arith.constant 0 : i32
    return %c0_i32, %c0_i32_0, %c0_i32_1 : i32, i32, i32
  }
  func.func @transform_7(%arg0: i32) -> (i32, i32, i32) {
    %c0_i32 = arith.constant 0 : i32
    %c0_i32_0 = arith.constant 0 : i32
    %c0_i32_1 = arith.constant 0 : i32
    return %c0_i32, %c0_i32_0, %arg0 : i32, i32, i32
  }
  func.func @transform_8(%arg0: i32) -> (i32, i32, i32) {
    %c0_i32 = arith.constant 0 : i32
    %c0_i32_0 = arith.constant 0 : i32
    %c0_i32_1 = arith.constant 0 : i32
    return %c0_i32, %c0_i32_0, %arg0 : i32, i32, i32
  }
}

</mosaic_0001>

<bundles_post_ra>
// kernel: teacher_student_forward.1
= control target key start
LH: loop header
LB: loop body
LE: loop exit
PB: predicated region body
PF: predicated region fallthrough
CT: control target
= control target key end

     0   :  { %13 = vsyncpa [#allocation4], 0  ;;  %s2354_s0 = inlined_call_operand.vmem [shape: bf16[16,1024], index: 0, kind: input, shape index: {}]   ;;  %s2355_s1 = inlined_call_operand.hbm [shape: bf16[1024,128], index: 1, kind: input, shape index: {}]   ;;  %s2356_s2 = inlined_call_operand.vmem [shape: f32[1,128], index: 2, kind: input, shape index: {}]   ;;  %s2357_s3 = inlined_call_operand.vmem [shape: bf16[128,256], index: 3, kind: input, shape index: {}]   ;;  %s2358_s4 = inlined_call_operand.vmem [shape: f32[1,256], index: 4, kind: input, shape index: {}]   ;;  %s2359_s5 = inlined_call_operand.vmem [shape: bf16[2,128,128], index: 5, kind: input, shape index: {}]   ;;  %s2360_s6 = inlined_call_operand.vmem [shape: f32[2,1,128], index: 6, kind: input, shape index: {}]   ;;  %s2361_s7 = inlined_call_operand.hbm [shape: bf16[2,128,128], index: 7, kind: input, shape index: {}]   ;;  %s2362_s8 = inlined_call_operand.vmem [shape: f32[2,16,128], index: 8, kind: output, shape index: {}]  }
   0x1   :  { %14 = vsyncpa [#allocation6], 0  ;;  %s2092_s27 = smov [#allocation3]  }
   0x2   :  { %s22_s28 = sshll.u32 %s2092_s27, 4  ;;  %s23_s28 = int_to_ptr.vmem [resolvable:$true] %s22_s28 }
   0x3   :  { %s2056_s29 = scalar_lea.vmem %s23_s28, 8192  ;;  %p2061_p1 = scmp.lt.s32.totalorder %s23_s28, %s23_s28 }
   0x4   :  { %p2057_p0 = scmp.ne.s32.totalorder %s23_s28, %s2056_s29  ;;  %p2062_p2 = scmp.lt.s32.totalorder %s2056_s29, %s2056_s29 }
   0x6   :  { %p2063_p3 = por %p2062_p2, %p2061_p1 }
   0x8   :  { %p2064_p4 = pnand %p2063_p3, %p2057_p0 }
   0xa   :  { %2067 = shalt.err (!%p2064_p4)
}
   0xb   :  { %s2093_s30 = smov 64   ;;  %s2094_s9 = smov 4  }
   0xc   :  { %28 = dma.hbm_to_vmem [thread:$0]  %s2355_s1, 8192, %s23_s28, [#allocation4], %s2093_s30, %s2093_s30, %s2094_s9  }
   0xd   :  { %s2095_s12 = smov [#allocation5]  }
   0xe   :  { %s44_s13 = sshll.u32 %s2095_s12, 4  ;;  %s45_s13 = int_to_ptr.vmem [resolvable:$true] %s44_s13 }
   0xf   :  { %s2076_s14 = scalar_lea.vmem %s45_s13, 2048  ;;  %p2081_p6 = scmp.lt.s32.totalorder %s45_s13, %s45_s13 }
  0x10   :  { %p2077_p5 = scmp.ne.s32.totalorder %s45_s13, %s2076_s14  ;;  %p2082_p7 = scmp.lt.s32.totalorder %s2076_s14, %s2076_s14 }
  0x12   :  { %p2083_p8 = por %p2082_p7, %p2081_p6 }
  0x14   :  { %p2084_p9 = pnand %p2083_p8, %p2077_p5 }
  0x16   :  { %2087 = shalt.err (!%p2084_p9)
}
  0x17   :  { %50 = dma.hbm_to_vmem [thread:$0]  %s2361_s7, 2048, %s45_s13, [#allocation6], %s2093_s30, %s2093_s30, %s2094_s9  }
  0x18   :  { %2088 = dma.done.wait [#allocation4], 8192  }
  0x19   :  { %2089 = vsyncadd [#allocation4], 4294959104 }
  0x1a   :  { %2090 = dma.done.wait [#allocation6], 2048  }
  0x1b   :  { %2091 = vsyncadd [#allocation6], 4294965248  ;;  %v1902_v0 = vld [vmem:[#allocation3 + $0x78] sm:$0xff]   ;;  %v1906_v4 = vld [vmem:[#allocation3 + $0x70] sm:$0xff]   ;;  %vm2098_vm0 = vmmov 0  }
  0x1c   :  { %v1903_v1 = vld [vmem:[#allocation3 + $0xf8] sm:$0xff]   ;;  %1691 = vmatprep.subr.bf16.mxu0 %v1902_v0  ;;  %v1907_v5 = vld [vmem:[#allocation3 + $0xf0] sm:$0xff]   ;;  %v1910_v8 = vld [vmem:[#allocation3 + $0x68] sm:$0xff]  }
  0x1d   :  { %v1904_v2 = vld [vmem:[#allocation3 + $0x38] sm:$0xff]   ;;  %1713 = vmatprep.subr.bf16.mxu1 %v1903_v1  ;;  %v1908_v6 = vld [vmem:[#allocation3 + $0x30] sm:$0xff]   ;;  %v1911_v9 = vld [vmem:[#allocation3 + $0xe8] sm:$0xff]  }
  0x1e   :  { %v1905_v3 = vld [vmem:[#allocation3 + $0xb8] sm:$0xff]   ;;  %1692 = vmatpush3.bf16.msra.mxu0 %v1904_v2  ;;  %v1909_v7 = vld [vmem:[#allocation3 + $0xb0] sm:$0xff]   ;;  %v1912_v10 = vld [vmem:[#allocation3 + $0x28] sm:$0xff]  }
  0x1f   :  { %1714 = vmatpush3.bf16.msra.mxu1 %v1905_v3  ;;  %1693 = vmatprep.subr.bf16.mxu0 %v1906_v4  ;;  %v1913_v11 = vld [vmem:[#allocation3 + $0xa8] sm:$0xff]   ;;  %v1914_v12 = vld [vmem:[#allocation3 + $0x60] sm:$0xff]   ;;  %v1918_v16 = vld [vmem:[#allocation3 + $0x58] sm:$0xff]  }
  0x20   :  { %1715 = vmatprep.subr.bf16.mxu1 %v1907_v5  ;;  %v1915_v13 = vld [vmem:[#allocation3 + $0xe0] sm:$0xff]   ;;  %v1919_v17 = vld [vmem:[#allocation3 + $0xd8] sm:$0xff]   ;;  %v1922_v20 = vld [vmem:[#allocation3 + $0x50] sm:$0xff]  }
  0x21   :  { %v1916_v14 = vld [vmem:[#allocation3 + $0x20] sm:$0xff]   ;;  %v1920_v18 = vld [vmem:[#allocation3 + $0x18] sm:$0xff]   ;;  %v1923_v21 = vld [vmem:[#allocation3 + $0xd0] sm:$0xff]  }
  0x22   :  { %1694 = vmatpush3.bf16.msra.mxu0 %v1908_v6  ;;  %v1917_v15 = vld [vmem:[#allocation3 + $0xa0] sm:$0xff]   ;;  %v1921_v19 = vld [vmem:[#allocation3 + $0x98] sm:$0xff]   ;;  %v1924_v22 = vld [vmem:[#allocation3 + $0x10] sm:$0xff]  }
  0x23   :  { %1716 = vmatpush3.bf16.msra.mxu1 %v1909_v7  ;;  %1695 = vmatprep.subr.bf16.mxu0 %v1910_v8  ;;  %v1925_v23 = vld [vmem:[#allocation3 + $0x90] sm:$0xff]   ;;  %v1926_v24 = vld [vmem:[#allocation3 + $0x48] sm:$0xff]   ;;  %v1930_v28 = vld [vmem:[#allocation3 + $0x40] sm:$0xff]  }
  0x24   :  { %1717 = vmatprep.subr.bf16.mxu1 %v1911_v9  ;;  %v1927_v25 = vld [vmem:[#allocation3 + $0xc8] sm:$0xff]   ;;  %v1931_v29 = vld [vmem:[#allocation3 + $0xc0] sm:$0xff]   ;;  %v62_v32 = vld [vmem:[%s2354_s0] sm:$0xff] }
  0x25   :  { %v1928_v26 = vld [vmem:[#allocation3 + $0x8] sm:$0xff]   ;;  %v1932_v30 = vld [vmem:[#allocation3] sm:$0xff]   ;;  %v66_v33 = vld [vmem:[%s2354_s0 + $0x20] sm:$0xff] }
  0x26   :  { %1696 = vmatpush3.bf16.msra.mxu0 %v1912_v10  ;;  %v1929_v27 = vld [vmem:[#allocation3 + $0x88] sm:$0xff]   ;;  %v1933_v31 = vld [vmem:[#allocation3 + $0x80] sm:$0xff]   ;;  %v63_v34 = vld [vmem:[%s2354_s0 + $0x8] sm:$0xff]  ;;  %v1530_v35 = vcombine.low %v62_v32, %v66_v33  ;;  %v1531_v36 = vcombine.high %v62_v32, %v66_v33  ;;  %v2096_v32 = vmov 0  }
  0x27   :  { %1718 = vmatpush3.bf16.msra.mxu1 %v1913_v11  ;;  %1697 = vmatprep.subr.bf16.mxu0 %v1914_v12  ;;  %v67_v37 = vld [vmem:[%s2354_s0 + $0x28] sm:$0xff]  ;;  %v1938_v44 = vld [vmem:[#allocation3 + $0x170] sm:$0xff]   ;;  %v1942_v48 = vld [vmem:[#allocation3 + $0x168] sm:$0xff]  }
  0x28   :  { %1719 = vmatprep.subr.bf16.mxu1 %v1915_v13  ;;  %v1532_v38 = vcombine.low %v63_v34, %v67_v37  ;;  %v1533_v39 = vcombine.high %v63_v34, %v67_v37  ;;  %v1934_v40 = vld [vmem:[#allocation3 + $0x178] sm:$0xff]   ;;  %661 = vmatprep.mubr.bf16.mxu0 %v1531_v36  ;;  %v1939_v45 = vld [vmem:[#allocation3 + $0x1f0] sm:$0xff]   ;;  %v1943_v49 = vld [vmem:[#allocation3 + $0x1e8] sm:$0xff]  }
  0x29   :  { %v1935_v41 = vld [vmem:[#allocation3 + $0x1f8] sm:$0xff]   ;;  %v1940_v46 = vld [vmem:[#allocation3 + $0x130] sm:$0xff]   ;;  %v1944_v50 = vld [vmem:[#allocation3 + $0x128] sm:$0xff]  }
  0x2a   :  { %1698 = vmatpush3.bf16.msra.mxu0 %v1916_v14  ;;  %702 = vmatprep.mubr.bf16.mxu1 %v1533_v39  ;;  %v1936_v42 = vld [vmem:[#allocation3 + $0x138] sm:$0xff]   ;;  %v1941_v47 = vld [vmem:[#allocation3 + $0x1b0] sm:$0xff]   ;;  %v1945_v51 = vld [vmem:[#allocation3 + $0x1a8] sm:$0xff]  }
  0x2b   :  { %1720 = vmatpush3.bf16.msra.mxu1 %v1917_v15  ;;  %1699 = vmatprep.subr.bf16.mxu0 %v1918_v16  ;;  %v1937_v43 = vld [vmem:[#allocation3 + $0x1b8] sm:$0xff]   ;;  %v1946_v52 = vld [vmem:[#allocation3 + $0x160] sm:$0xff]   ;;  %v1954_v60 = vld [vmem:[#allocation3 + $0x150] sm:$0xff]  }
  0x2c   :  { %1721 = vmatprep.subr.bf16.mxu1 %v1919_v17  ;;  %v1947_v53 = vld [vmem:[#allocation3 + $0x1e0] sm:$0xff]   ;;  %v1950_v56 = vld [vmem:[#allocation3 + $0x158] sm:$0xff]   ;;  %v1955_v61 = vld [vmem:[#allocation3 + $0x1d0] sm:$0xff]  }
  0x2d   :  { %v1948_v54 = vld [vmem:[#allocation3 + $0x120] sm:$0xff]   ;;  %v1951_v57 = vld [vmem:[#allocation3 + $0x1d8] sm:$0xff]   ;;  %v1956_v62 = vld [vmem:[#allocation3 + $0x110] sm:$0xff]  }
  0x2e   :  { %1700 = vmatpush3.bf16.msra.mxu0 %v1920_v18  ;;  %v1949_v55 = vld [vmem:[#allocation3 + $0x1a0] sm:$0xff]   ;;  %v1952_v58 = vld [vmem:[#allocation3 + $0x118] sm:$0xff]   ;;  %v1957_v63 = vld [vmem:[#allocation3 + $0x190] sm:$0xff]  }
  0x2f   :  { %1722 = vmatpush3.bf16.msra.mxu1 %v1921_v19  ;;  %1701 = vmatprep.subr.bf16.mxu0 %v1922_v20  ;;  %v1953_v59 = vld [vmem:[#allocation3 + $0x198] sm:$0xff]   ;;  %v1958_v0 = vld [vmem:[#allocation3 + $0x148] sm:$0xff]   ;;  %v1962_v4 = vld [vmem:[#allocation3 + $0x140] sm:$0xff]  }
  0x30   :  { %1723 = vmatprep.subr.bf16.mxu1 %v1923_v21  ;;  %v1959_v1 = vld [vmem:[#allocation3 + $0x1c8] sm:$0xff]   ;;  %v1963_v5 = vld [vmem:[#allocation3 + $0x1c0] sm:$0xff]   ;;  %v1971_v18 = vld [vmem:[%s2357_s3 + $0x64] ss:$8 sps:$4 sm:$0xff]  }
  0x31   :  { %v1960_v2 = vld [vmem:[#allocation3 + $0x108] sm:$0xff]   ;;  %v1964_v6 = vld [vmem:[#allocation3 + $0x100] sm:$0xff]   ;;  %v1969_v19 = vld [vmem:[%s2357_s3 + $0x60] ss:$8 sps:$4 sm:$0xff]  }
  0x32   :  { %1702 = vmatpush3.bf16.msra.mxu0 %v1924_v22  ;;  %v1961_v3 = vld [vmem:[#allocation3 + $0x188] sm:$0xff]   ;;  %v1965_v7 = vld [vmem:[#allocation3 + $0x180] sm:$0xff]   ;;  %v1977_v22 = vld [vmem:[%s2357_s3 + $0x44] ss:$8 sps:$4 sm:$0xff]  }
  0x33   :  { %1724 = vmatpush3.bf16.msra.mxu1 %v1925_v23  ;;  %1703 = vmatprep.subr.bf16.mxu0 %v1926_v24  ;;  %v64_v8 = vld [vmem:[%s2354_s0 + $0x10] sm:$0xff]  ;;  %v65_v12 = vld [vmem:[%s2354_s0 + $0x18] sm:$0xff]  ;;  %v1975_v23 = vld [vmem:[%s2357_s3 + $0x40] ss:$8 sps:$4 sm:$0xff]  }
  0x34   :  { %1725 = vmatprep.subr.bf16.mxu1 %v1927_v25  ;;  %v68_v9 = vld [vmem:[%s2354_s0 + $0x30] sm:$0xff]  ;;  %v69_v13 = vld [vmem:[%s2354_s0 + $0x38] sm:$0xff] }
  0x35   :  { %v1534_v10 = vcombine.low %v64_v8, %v68_v9  ;;  %v1535_v11 = vcombine.high %v64_v8, %v68_v9  ;;  %v1536_v14 = vcombine.low %v65_v12, %v69_v13  ;;  %v1537_v15 = vcombine.high %v65_v12, %v69_v13  ;;  %v1966_v16 = vld [vmem:[%s2357_s3 + $0x70] ss:$8 sps:$4 sm:$0xff]   ;;  %v1968_v17 = vld [vmem:[%s2357_s3 + $0x74] ss:$8 sps:$4 sm:$0xff]   ;;  %v1994_v8 = vld [vmem:[%s2359_s5 + $0x28] sm:$0xff]  }
  0x36   :  { %1704 = vmatpush3.bf16.msra.mxu0 %v1928_v26  ;;  %v1974_v20 = vld [vmem:[%s2357_s3 + $0x54] ss:$8 sps:$4 sm:$0xff]   ;;  %v1972_v21 = vld [vmem:[%s2357_s3 + $0x50] ss:$8 sps:$4 sm:$0xff]   ;;  %v1983_v26 = vld [vmem:[%s2357_s3 + $0x24] ss:$8 sps:$4 sm:$0xff]  }
  0x37   :  { %1726 = vmatpush3.bf16.msra.mxu1 %v1929_v27  ;;  %1705 = vmatprep.subr.bf16.mxu0 %v1930_v28  ;;  %v1980_v24 = vld [vmem:[%s2357_s3 + $0x34] ss:$8 sps:$4 sm:$0xff]   ;;  %v1978_v25 = vld [vmem:[%s2357_s3 + $0x30] ss:$8 sps:$4 sm:$0xff]   ;;  %v1981_v27 = vld [vmem:[%s2357_s3 + $0x20] ss:$8 sps:$4 sm:$0xff]  }
  0x38   :  { %1727 = vmatprep.subr.bf16.mxu1 %v1931_v29  ;;  %v1986_v28 = vld [vmem:[%s2357_s3 + $0x14] ss:$8 sps:$4 sm:$0xff]   ;;  %v1984_v29 = vld [vmem:[%s2357_s3 + $0x10] ss:$8 sps:$4 sm:$0xff]   ;;  %v1995_v9 = vld [vmem:[%s2359_s5 + $0x68] sm:$0xff]  }
  0x39   :  { %v1998_v12 = vld [vmem:[%s2359_s5 + $0x18] sm:$0xff]  }
  0x3a   :  { %1706 = vmatpush3.bf16.msra.mxu0 %v1932_v30  ;;  %v1989_v30 = vld [vmem:[%s2357_s3 + $0x4] ss:$8 sps:$4 sm:$0xff]   ;;  %v1999_v13 = vld [vmem:[%s2359_s5 + $0x58] sm:$0xff]  }
  0x3b   :  { %1728 = vmatpush3.bf16.msra.mxu1 %v1933_v31  ;;  %1735 = vmatprep.subr.bf16.mxu0 %v1934_v40  ;;  %v1987_v31 = vld [vmem:[%s2357_s3] ss:$8 sps:$4 sm:$0xff]  }
  0x3c   :  { %1757 = vmatprep.subr.bf16.mxu1 %v1935_v41  ;;  %v1529_v41 = vld [vmem:[%s2356_s2] ss:$0 sm:$0xff] }
  0x3d   :  { %662 = vmatmul.mubr.bf16.vlgmr.msra.gmra.mxu0 %v1530_v35 }
  0x3e   :  { %703 = vmatmul.mubr.bf16.vlgmr.msra.gmra.mxu1 %v1532_v38  ;;  %1736 = vmatpush3.bf16.msra.mxu0 %v1936_v42 }
  0x3f   :  { %1758 = vmatpush3.bf16.msra.mxu1 %v1937_v43  ;;  %1737 = vmatprep.subr.bf16.mxu0 %v1938_v44 }
  0x40   :  { %1759 = vmatprep.subr.bf16.mxu1 %v1939_v45  ;;  %743 = vmatprep.mubr.bf16.mxu0 %v1535_v11  ;;  %v1997_v11 = vld [vmem:[%s2359_s5 + $0x60] sm:$0xff]  }
  0x41   :  { %784 = vmatprep.mubr.bf16.mxu1 %v1537_v15  ;;  %v2001_v15 = vld [vmem:[%s2359_s5 + $0x50] sm:$0xff]  }
  0x42   :  { %1738 = vmatpush3.bf16.msra.mxu0 %v1940_v46 }
  0x43   :  { %1760 = vmatpush3.bf16.msra.mxu1 %v1941_v47  ;;  %1739 = vmatprep.subr.bf16.mxu0 %v1942_v48 }
  0x44   :  { %1761 = vmatprep.subr.bf16.mxu1 %v1943_v49 }
  0x46   :  { %1740 = vmatpush3.bf16.msra.mxu0 %v1944_v50 }
  0x47   :  { %1762 = vmatpush3.bf16.msra.mxu1 %v1945_v51  ;;  %1741 = vmatprep.subr.bf16.mxu0 %v1946_v52 }
  0x48   :  { %1763 = vmatprep.subr.bf16.mxu1 %v1947_v53 }
  0x4a   :  { %1742 = vmatpush3.bf16.msra.mxu0 %v1948_v54 }
  0x4b   :  { %1764 = vmatpush3.bf16.msra.mxu1 %v1949_v55  ;;  %1743 = vmatprep.subr.bf16.mxu0 %v1950_v56 }
  0x4c   :  { %1765 = vmatprep.subr.bf16.mxu1 %v1951_v57 }
  0x4e   :  { %1744 = vmatpush3.bf16.msra.mxu0 %v1952_v58 }
  0x4f   :  { %1766 = vmatpush3.bf16.msra.mxu1 %v1953_v59  ;;  %1745 = vmatprep.subr.bf16.mxu0 %v1954_v60 }
  0x50   :  { %1767 = vmatprep.subr.bf16.mxu1 %v1955_v61 }
  0x52   :  { %1746 = vmatpush3.bf16.msra.mxu0 %v1956_v62 }
  0x53   :  { %1768 = vmatpush3.bf16.msra.mxu1 %v1957_v63  ;;  %1747 = vmatprep.subr.bf16.mxu0 %v1958_v0 }
  0x54   :  { %1769 = vmatprep.subr.bf16.mxu1 %v1959_v1 }
  0x56   :  { %1748 = vmatpush3.bf16.msra.mxu0 %v1960_v2 }
  0x57   :  { %1770 = vmatpush3.bf16.msra.mxu1 %v1961_v3  ;;  %1749 = vmatprep.subr.bf16.mxu0 %v1962_v4  ;;  %v1990_v3 = vld [vmem:[%s2359_s5 + $0x38] sm:$0xff]   ;;  %v2097_v4 = vmov 0.0  }
  0x58   :  { %1771 = vmatprep.subr.bf16.mxu1 %v1963_v5  ;;  %v1991_v5 = vld [vmem:[%s2359_s5 + $0x78] sm:$0xff]  }
  0x5a   :  { %1750 = vmatpush3.bf16.msra.mxu0 %v1964_v6  ;;  %v1992_v6 = vld [vmem:[%s2359_s5 + $0x30] sm:$0xff]  }
  0x5b   :  { %1772 = vmatpush3.bf16.msra.mxu1 %v1965_v7  ;;  %902 = vmatprep.subr.bf16.mxu0 %v1968_v17  ;;  %v1993_v7 = vld [vmem:[%s2359_s5 + $0x70] sm:$0xff]   ;;  %v2003_v17 = vld [vmem:[%s2359_s5 + $0x48] sm:$0xff]  }
  0x5c   :  { %1815 = vmatprep.subr.bf16.mxu1 %v2097_v4 }
  0x5d   :  { %744 = vmatmul.mubr.bf16.vlgmr.msra.gmra.mxu0 %v1534_v10  ;;  %v1996_v10 = vld [vmem:[%s2359_s5 + $0x20] sm:$0xff]  }
  0x5e   :  { %785 = vmatmul.mubr.bf16.vlgmr.msra.gmra.mxu1 %v1536_v14  ;;  %903 = vmatpush1.bf16.msra.mxu0 %v1966_v16  ;;  %v2000_v14 = vld [vmem:[%s2359_s5 + $0x10] sm:$0xff]   ;;  %v2002_v16 = vld [vmem:[%s2359_s5 + $0x8] sm:$0xff]  }
  0x5f   :  { %904 = vmatprep.subr.bf16.mxu0 %v1971_v18  ;;  %934 = vmatprep.mubr.bf16.mxu0 %v2096_v32  ;;  %v2004_v18 = vld [vmem:[%s2359_s5] sm:$0xff]  }
  0x60   :  { %1816 = vmatpush3.bf16.msra.mxu1 %v1990_v3  ;;  %1831 = vmatprep.mubr.msk.bf16.mxu1 %vm2098_vm0, %v2097_v4 }
  0x61   :  { %1817 = vmatprep.subr.bf16.mxu1 %v2097_v4 }
  0x62   :  { %905 = vmatpush1.bf16.msra.mxu0 %v1969_v19  ;;  %v2005_v19 = vld [vmem:[%s2359_s5 + $0x40] sm:$0xff]  }
  0x63   :  { %906 = vmatprep.subr.bf16.mxu0 %v1974_v20  ;;  %v812_v20 = vlaneseq }
  0x64   :  { %1818 = vmatpush3.bf16.msra.mxu1 %v1992_v6 }
  0x65   :  { %1819 = vmatprep.subr.bf16.mxu1 %v2097_v4 }
  0x66   :  { %907 = vmatpush1.bf16.msra.mxu0 %v1972_v21  ;;  %v813_v21 = vshrl.u32 %v812_v20, 7 }
  0x67   :  { %908 = vmatprep.subr.bf16.mxu0 %v1977_v22 }
  0x68   :  { %1820 = vmatpush3.bf16.msra.mxu1 %v1994_v8  ;;  %v814_v22 = vsub.s32 0, %v813_v21 }
  0x69   :  { %1821 = vmatprep.subr.bf16.mxu1 %v2097_v4 }
  0x6a   :  { %909 = vmatpush1.bf16.msra.mxu0 %v1975_v23  ;;  %v810_v23 = vld [vmem:[%s2358_s4] sm:$0x3] }
  0x6b   :  { %910 = vmatprep.subr.bf16.mxu0 %v1980_v24  ;;  %v818_v24 = vsub.s32 1, %v813_v21 }
  0x6c   :  { %1822 = vmatpush3.bf16.msra.mxu1 %v1996_v10  ;;  %v1618_v10 = vld [vmem:[%s2360_s6] ss:$0 sm:$0xff] }
  0x6d   :  { %1823 = vmatprep.subr.bf16.mxu1 %v2097_v4 }
  0x6e   :  { %911 = vmatpush1.bf16.msra.mxu0 %v1978_v25  ;;  %v815_v25 = vrot.slane %v810_v23, %v814_v22 }
  0x6f   :  { %912 = vmatprep.subr.bf16.mxu0 %v1983_v26  ;;  %v819_v26 = vrot.slane %v810_v23, %v818_v24 }
  0x70   :  { %1824 = vmatpush3.bf16.msra.mxu1 %v1998_v12  ;;  %v1646_v12 = vld [vmem:[%s2360_s6 + $0x1] ss:$0 sm:$0xff] }
  0x71   :  { %1825 = vmatprep.subr.bf16.mxu1 %v2097_v4 }
  0x72   :  { %913 = vmatpush1.bf16.msra.mxu0 %v1981_v27 }
  0x73   :  { %914 = vmatprep.subr.bf16.mxu0 %v1986_v28 }
  0x74   :  { %1826 = vmatpush3.bf16.msra.mxu1 %v2000_v14 }
  0x75   :  { %1827 = vmatprep.subr.bf16.mxu1 %v2097_v4 }
  0x76   :  { %915 = vmatpush1.bf16.msra.mxu0 %v1984_v29 }
  0x77   :  { %916 = vmatprep.subr.bf16.mxu0 %v1989_v30 }
  0x78   :  { %1828 = vmatpush3.bf16.msra.mxu1 %v2002_v16 }
  0x79   :  { %1829 = vmatprep.subr.bf16.mxu1 %v2097_v4 }
  0x7a   :  { %917 = vmatpush1.bf16.msra.mxu0 %v1987_v31 }
  0x7b   :  { %1835 = vmatprep.subr.bf16.mxu0 %v2097_v4 }
  0x7c   :  { %1830 = vmatpush3.bf16.msra.mxu1 %v2004_v18 }
  0x7d   :  { %1855 = vmatprep.subr.bf16.mxu1 %v2097_v4 }
  0xfd   :  { %v1707_v33 = vpop.f32.mrf.mxu0 }
  0xfe   :  { %v1729_v34 = vpop.f32.mrf.mxu1 }
  0xff   :  { %v1708_v35 = vpop.f32.mrf.mxu0 }
 0x100   :  { %v1730_v36 = vpop.f32.mrf.mxu1  ;;  %v1709_v40 = vadd.f32 %v1708_v35, %v1707_v33 }
 0x101   :  { %v1710_v37 = vpop.f32.mrf.mxu0  ;;  %v1731_v46 = vadd.f32 %v1730_v36, %v1729_v34 }
 0x102   :  { %v1732_v38 = vpop.f32.mrf.mxu1  ;;  %v664_v45 = vadd.f32 %v1709_v40, %v1529_v41 }
 0x103   :  { %v1711_v39 = vpop.f32.mrf.mxu0 }
 0x104   :  { %v1712_v42 = vadd.f32 %v1711_v39, %v1710_v37  ;;  %v1733_v43 = vpop.f32.mrf.mxu1  ;;  %v705_v53 = vadd.f32 %v1731_v46, %v664_v45 }
 0x105   :  { %v1734_v54 = vadd.f32 %v1733_v43, %v1732_v38 }
 0x106   :  { %v667_v49 = vadd.f32 %v1712_v42, %v1529_v41 }
 0x108   :  { %v708_v57 = vadd.f32 %v1734_v54, %v667_v49 }
 0x11d   :  { %v1751_v44 = vpop.f32.mrf.mxu0 }
 0x11e   :  { %v1773_v47 = vpop.f32.mrf.mxu1 }
 0x11f   :  { %v1752_v48 = vpop.f32.mrf.mxu0 }
 0x120   :  { %v1753_v50 = vadd.f32 %v1752_v48, %v1751_v44  ;;  %v1774_v51 = vpop.f32.mrf.mxu1 }
 0x121   :  { %v1754_v52 = vpop.f32.mrf.mxu0  ;;  %v1775_v61 = vadd.f32 %v1774_v51, %v1773_v47 }
 0x122   :  { %v1776_v55 = vpop.f32.mrf.mxu1  ;;  %v746_v58 = vadd.f32 %v1753_v50, %v705_v53 }
 0x123   :  { %v1755_v56 = vpop.f32.mrf.mxu0 }
 0x124   :  { %v1756_v59 = vadd.f32 %v1755_v56, %v1754_v52  ;;  %v1777_v60 = vpop.f32.mrf.mxu1  ;;  %v787_v0 = vadd.f32 %v1775_v61, %v746_v58 }
 0x125   :  { %v1778_v63 = vadd.f32 %v1777_v60, %v1776_v55 }
 0x126   :  { %v749_v62 = vadd.f32 %v1756_v59, %v708_v57 }
 0x128   :  { %v790_v1 = vadd.f32 %v1778_v63, %v749_v62 }
 0x12a   :  { %v793_v2 = vpack.c.bf16 %v790_v1, %v787_v0 }
 0x12c   :  { %935 = vmatmul.mubr.bf16.vlgmr.msra.gmra.mxu0 %v793_v2 }
 0x12d   :  { %1836 = vmatpush3.bf16.msra.mxu0 %v1991_v5  ;;  %1851 = vmatprep.mubr.msk.bf16.mxu0 %vm2098_vm0, %v2097_v4 }
 0x12e   :  { %1837 = vmatprep.subr.bf16.mxu0 %v2097_v4 }
 0x131   :  { %1838 = vmatpush3.bf16.msra.mxu0 %v1993_v7 }
 0x132   :  { %1839 = vmatprep.subr.bf16.mxu0 %v2097_v4 }
 0x135   :  { %1840 = vmatpush3.bf16.msra.mxu0 %v1995_v9 }
 0x136   :  { %1841 = vmatprep.subr.bf16.mxu0 %v2097_v4 }
 0x139   :  { %1842 = vmatpush3.bf16.msra.mxu0 %v1997_v11 }
 0x13a   :  { %1843 = vmatprep.subr.bf16.mxu0 %v2097_v4 }
 0x13d   :  { %1844 = vmatpush3.bf16.msra.mxu0 %v1999_v13 }
 0x13e   :  { %1845 = vmatprep.subr.bf16.mxu0 %v2097_v4 }
 0x141   :  { %1846 = vmatpush3.bf16.msra.mxu0 %v2001_v15 }
 0x142   :  { %1847 = vmatprep.subr.bf16.mxu0 %v2097_v4 }
 0x145   :  { %1848 = vmatpush3.bf16.msra.mxu0 %v2003_v17 }
 0x146   :  { %1849 = vmatprep.subr.bf16.mxu0 %v2097_v4 }
 0x149   :  { %1850 = vmatpush3.bf16.msra.mxu0 %v2005_v19 }
 0x14a   :  { %1875 = vmatprep.subr.bf16.mxu0 %v2097_v4 }
 0x1ec   :  { %v936_v27 = vpop.f32.mrf.mxu0 }
 0x1ed   :  { %v937_v28 = vadd.f32 %v936_v27, %v815_v25 }
 0x1ee   :  { %v938_v29 = vpop.f32.mrf.mxu0 }
 0x1ef   :  { %v945_v30 = vmul.f32 %v937_v28, %v937_v28  ;;  %v939_v31 = vadd.f32 %v938_v29, %v819_v26 }
 0x1f0   :  { %v940_v32 = vpop.f32.mrf.mxu0 }
 0x1f1   :  { %v949_v33 = vmul.f32 %v945_v30, %v937_v28  ;;  %v946_v34 = vmul.f32 %v939_v31, %v939_v31  ;;  %v941_v35 = vadd.f32 %v940_v32, %v815_v25 }
 0x1f2   :  { %v942_v36 = vpop.f32.mrf.mxu0 }
 0x1f3   :  { %v953_v37 = vmul.f32 0.044715, %v949_v33  ;;  %v950_v38 = vmul.f32 %v946_v34, %v939_v31  ;;  %v947_v39 = vmul.f32 %v941_v35, %v941_v35  ;;  %v943_v40 = vadd.f32 %v942_v36, %v819_v26 }
 0x1f5   :  { %v957_v41 = vadd.f32 %v953_v37, %v937_v28  ;;  %v954_v42 = vmul.f32 0.044715, %v950_v38  ;;  %v951_v43 = vmul.f32 %v947_v39, %v941_v35  ;;  %v948_v44 = vmul.f32 %v943_v40, %v943_v40 }
 0x1f7   :  { %v961_v45 = vmul.f32 0.7978846, %v957_v41  ;;  %v958_v46 = vadd.f32 %v954_v42, %v939_v31  ;;  %v955_v47 = vmul.f32 0.044715, %v951_v43  ;;  %v952_v48 = vmul.f32 %v948_v44, %v943_v40 }
 0x1f9   :  { %2024 = vtanh.f32 %v961_v45  ;;  %v962_v49 = vmul.f32 0.7978846, %v958_v46  ;;  %v959_v50 = vadd.f32 %v955_v47, %v941_v35  ;;  %v956_v51 = vmul.f32 0.044715, %v952_v48 }
 0x1fb   :  { %2026 = vtanh.f32 %v962_v49  ;;  %v963_v52 = vmul.f32 0.7978846, %v959_v50  ;;  %v960_v53 = vadd.f32 %v956_v51, %v943_v40 }
 0x1fd   :  { %2028 = vtanh.f32 %v963_v52  ;;  %v964_v54 = vmul.f32 0.7978846, %v960_v53 }
 0x1ff   :  { %2030 = vtanh.f32 %v964_v54 }
 0x206   :  { %v2025_v55 = vpop.eup %2024 }
 0x207   :  { %v969_v56 = vadd.f32 1.0, %v2025_v55 }
 0x208   :  { %v2027_v57 = vpop.eup %2026 }
 0x209   :  { %v970_v58 = vadd.f32 1.0, %v2027_v57  ;;  %v973_v60 = vmul.f32 0.5, %v969_v56 }
 0x20a   :  { %v2029_v59 = vpop.eup %2028 }
 0x20b   :  { %v971_v61 = vadd.f32 1.0, %v2029_v59  ;;  %v974_v63 = vmul.f32 0.5, %v970_v58  ;;  %v977_v2 = vmul.f32 %v973_v60, %v937_v28 }
 0x20c   :  { %v2031_v62 = vpop.eup %2030 }
 0x20d   :  { %v975_v0 = vmul.f32 0.5, %v971_v61  ;;  %v972_v1 = vadd.f32 1.0, %v2031_v62  ;;  %v978_v6 = vmul.f32 %v974_v63, %v939_v31 }
 0x20f   :  { %v979_v3 = vmul.f32 %v975_v0, %v941_v35  ;;  %v976_v5 = vmul.f32 0.5, %v972_v1  ;;  %v2006_v0 = vld [vmem:[#allocation5 + $0x38] sm:$0xff]  }
 0x210   :  { %v2007_v1 = vld [vmem:[#allocation5 + $0x78] sm:$0xff]  }
 0x211   :  { %v980_v7 = vmul.f32 %v976_v5, %v943_v40  ;;  %v981_v8 = vpack.c.bf16 %v979_v3, %v977_v2  ;;  %v2008_v2 = vld [vmem:[#allocation5 + $0x30] sm:$0xff]   ;;  %v2010_v5 = vld [vmem:[#allocation5 + $0x28] sm:$0xff]  }
 0x212   :  { %v2009_v3 = vld [vmem:[#allocation5 + $0x70] sm:$0xff]  }
 0x213   :  { %1832 = vmatmul.mubr.bf16.vlgmr.msra.gmra.mxu1 %v981_v8  ;;  %v982_v9 = vpack.c.bf16 %v980_v7, %v978_v6  ;;  %v2011_v6 = vld [vmem:[#allocation5 + $0x68] sm:$0xff]   ;;  %v2012_v7 = vld [vmem:[#allocation5 + $0x20] sm:$0xff]  }
 0x214   :  { %1871 = vmatprep.mubr.msk.bf16.mxu1 %vm2098_vm0, %v2097_v4  ;;  %1856 = vmatpush3.bf16.msra.mxu1 %v2006_v0  ;;  %v2013_v8 = vld [vmem:[#allocation5 + $0x60] sm:$0xff]  }
 0x215   :  { %1852 = vmatmul.mubr.bf16.vlgmr.msra.gmra.mxu0 %v982_v9  ;;  %1857 = vmatprep.subr.bf16.mxu1 %v2097_v4  ;;  %v2014_v9 = vld [vmem:[#allocation5 + $0x18] sm:$0xff]  }
 0x216   :  { %1891 = vmatprep.mubr.msk.bf16.mxu0 %vm2098_vm0, %v2097_v4  ;;  %1876 = vmatpush3.bf16.msra.mxu0 %v2007_v1 }
 0x217   :  { %1877 = vmatprep.subr.bf16.mxu0 %v2097_v4 }
 0x218   :  { %1858 = vmatpush3.bf16.msra.mxu1 %v2008_v2 }
 0x219   :  { %1859 = vmatprep.subr.bf16.mxu1 %v2097_v4 }
 0x21a   :  { %1878 = vmatpush3.bf16.msra.mxu0 %v2009_v3 }
 0x21b   :  { %1879 = vmatprep.subr.bf16.mxu0 %v2097_v4 }
 0x21c   :  { %1860 = vmatpush3.bf16.msra.mxu1 %v2010_v5 }
 0x21d   :  { %1861 = vmatprep.subr.bf16.mxu1 %v2097_v4 }
 0x21e   :  { %1880 = vmatpush3.bf16.msra.mxu0 %v2011_v6 }
 0x21f   :  { %1881 = vmatprep.subr.bf16.mxu0 %v2097_v4 }
 0x220   :  { %1862 = vmatpush3.bf16.msra.mxu1 %v2012_v7 }
 0x221   :  { %1863 = vmatprep.subr.bf16.mxu1 %v2097_v4 }
 0x222   :  { %1882 = vmatpush3.bf16.msra.mxu0 %v2013_v8 }
 0x223   :  { %1883 = vmatprep.subr.bf16.mxu0 %v2097_v4 }
 0x224   :  { %1864 = vmatpush3.bf16.msra.mxu1 %v2014_v9 }
 0x225   :  { %1865 = vmatprep.subr.bf16.mxu1 %v2097_v4 }
 0x2d3   :  { %v1088_v11 = vpop.f32.mrf.mxu1 }
 0x2d4   :  { %v1089_v13 = vadd.f32 %v1618_v10, %v1088_v11  ;;  %v2016_v11 = vld [vmem:[#allocation5 + $0x10] sm:$0xff]  }
 0x2d5   :  { %v1833_v14 = vpop.f32.mrf.mxu1  ;;  %v1242_v15 = vpop.f32.mrf.mxu0  ;;  %1866 = vmatpush3.bf16.msra.mxu1 %v2016_v11 }
 0x2d6   :  { %v1095_v16 = vmul.f32 %v1089_v13, %v1089_v13  ;;  %v1243_v17 = vadd.f32 %v1646_v12, %v1242_v15  ;;  %1867 = vmatprep.subr.bf16.mxu1 %v2097_v4  ;;  %v2019_v14 = vld [vmem:[#allocation5 + $0x48] sm:$0xff]   ;;  %v2020_v15 = vld [vmem:[#allocation5] sm:$0xff]  }
 0x2d7   :  { %v1091_v18 = vpop.f32.mrf.mxu1  ;;  %v1853_v19 = vpop.f32.mrf.mxu0 }
 0x2d8   :  { %v1097_v20 = vmul.f32 %v1095_v16, %v1089_v13  ;;  %v1249_v21 = vmul.f32 %v1243_v17, %v1243_v17  ;;  %v1092_v22 = vadd.f32 %v1618_v10, %v1091_v18  ;;  %v2015_v10 = vld [vmem:[#allocation5 + $0x58] sm:$0xff]   ;;  %v2021_v16 = vld [vmem:[#allocation5 + $0x40] sm:$0xff]  }
 0x2d9   :  { %v1834_v23 = vpop.f32.mrf.mxu1  ;;  %v1245_v24 = vpop.f32.mrf.mxu0  ;;  %1884 = vmatpush3.bf16.msra.mxu0 %v2015_v10 }
 0x2da   :  { %v1099_v25 = vmul.f32 0.044715, %v1097_v20  ;;  %v1251_v26 = vmul.f32 %v1249_v21, %v1243_v17  ;;  %v1096_v27 = vmul.f32 %v1092_v22, %v1092_v22  ;;  %v1246_v28 = vadd.f32 %v1646_v12, %v1245_v24  ;;  %1885 = vmatprep.subr.bf16.mxu0 %v2097_v4  ;;  %v2017_v12 = vld [vmem:[#allocation5 + $0x50] sm:$0xff]  }
 0x2db   :  { %v1854_v29 = vpop.f32.mrf.mxu0 }
 0x2dc   :  { %v1101_v30 = vadd.f32 %v1099_v25, %v1089_v13  ;;  %v1253_v31 = vmul.f32 0.044715, %v1251_v26  ;;  %v1098_v32 = vmul.f32 %v1096_v27, %v1092_v22  ;;  %v1250_v33 = vmul.f32 %v1246_v28, %v1246_v28 }
 0x2dd   :  { %1886 = vmatpush3.bf16.msra.mxu0 %v2017_v12 }
 0x2de   :  { %v1255_v34 = vadd.f32 %v1253_v31, %v1243_v17  ;;  %v1100_v35 = vmul.f32 0.044715, %v1098_v32  ;;  %v1252_v36 = vmul.f32 %v1250_v33, %v1246_v28  ;;  %v1103_v37 = vmul.f32 0.7978846, %v1101_v30  ;;  %1887 = vmatprep.subr.bf16.mxu0 %v2097_v4 }
 0x2e0   :  { %v1102_v38 = vadd.f32 %v1100_v35, %v1092_v22  ;;  %v1254_v39 = vmul.f32 0.044715, %v1252_v36  ;;  %2032 = vtanh.f32 %v1103_v37  ;;  %v1257_v40 = vmul.f32 0.7978846, %v1255_v34 }
 0x2e1   :  { %1888 = vmatpush3.bf16.msra.mxu0 %v2019_v14 }
 0x2e2   :  { %v1104_v41 = vmul.f32 0.7978846, %v1102_v38  ;;  %v1256_v42 = vadd.f32 %v1254_v39, %v1246_v28  ;;  %2034 = vtanh.f32 %v1257_v40  ;;  %1889 = vmatprep.subr.bf16.mxu0 %v2097_v4 }
 0x2e4   :  { %v1258_v43 = vmul.f32 0.7978846, %v1256_v42  ;;  %2036 = vtanh.f32 %v1104_v41 }
 0x2e5   :  { %1890 = vmatpush3.bf16.msra.mxu0 %v2021_v16 }
 0x2e6   :  { %2038 = vtanh.f32 %v1258_v43 }
 0x2ed   :  { %v2033_v44 = vpop.eup %2032 }
 0x2ee   :  { %v1107_v45 = vadd.f32 1.0, %v2033_v44 }
 0x2ef   :  { %v2035_v46 = vpop.eup %2034 }
 0x2f0   :  { %v1109_v47 = vmul.f32 0.5, %v1107_v45  ;;  %v1261_v48 = vadd.f32 1.0, %v2035_v46 }
 0x2f1   :  { %v2037_v49 = vpop.eup %2036 }
 0x2f2   :  { %v2308_v50 = vmul.f32 %v1109_v47, %v1089_v13  ;;  %v1263_v51 = vmul.f32 0.5, %v1261_v48  ;;  %v1108_v52 = vadd.f32 1.0, %v2037_v49  ;;  %v2018_v13 = vld [vmem:[#allocation5 + $0x8] sm:$0xff]  }
 0x2f3   :  { %v2039_v53 = vpop.eup %2038  ;;  %1868 = vmatpush3.bf16.msra.mxu1 %v2018_v13 }
 0x2f4   :  { %v1113_v54 = vmul.f32 %v2308_v50, %v2308_v50  ;;  %v2312_v55 = vmul.f32 %v1263_v51, %v1243_v17  ;;  %v1110_v56 = vmul.f32 0.5, %v1108_v52  ;;  %v1262_v57 = vadd.f32 1.0, %v2039_v53  ;;  %1869 = vmatprep.subr.bf16.mxu1 %v2097_v4 }
 0x2f6   :  { %1115 = vadd.xlane.f32.xlu0 %v1113_v54  ;;  %v1267_v58 = vmul.f32 %v2312_v55, %v2312_v55  ;;  %v2316_v59 = vmul.f32 %v1110_v56, %v1092_v22  ;;  %v1264_v60 = vmul.f32 0.5, %v1262_v57 }
 0x2f7   :  { %1870 = vmatpush3.bf16.msra.mxu1 %v2020_v15 }
 0x2f8   :  { %1269 = vadd.xlane.f32.xlu1 %v1267_v58  ;;  %v1114_v61 = vmul.f32 %v2316_v59, %v2316_v59  ;;  %v2320_v62 = vmul.f32 %v1264_v60, %v1246_v28 }
 0x2fa   :  { %1117 = vadd.xlane.f32.xlu0 %v1114_v61  ;;  %v1268_v63 = vmul.f32 %v2320_v62, %v2320_v62 }
 0x2fc   :  { %1271 = vadd.xlane.f32.xlu1 %v1268_v63 }
 0x37f   :  { %v1116_v17 = vpop.xlane.xlu0 %1115 }
 0x380   :  { %v1119_v18 = vadd.f32 1e-12, %v1116_v17 }
 0x381   :  { %v1270_v19 = vpop.xlane.xlu1 %1269 }
 0x382   :  { %v1273_v20 = vadd.f32 1e-12, %v1270_v19  ;;  %2040 = vrsqrt.f32 %v1119_v18 }
 0x383   :  { %v1118_v21 = vpop.xlane.xlu0 %1117 }
 0x384   :  { %v1120_v22 = vadd.f32 1e-12, %v1118_v21  ;;  %2042 = vrsqrt.f32 %v1273_v20 }
 0x385   :  { %v1272_v23 = vpop.xlane.xlu1 %1271 }
 0x386   :  { %2044 = vrsqrt.f32 %v1120_v22  ;;  %v1274_v24 = vadd.f32 1e-12, %v1272_v23 }
 0x388   :  { %2046 = vrsqrt.f32 %v1274_v24 }
 0x38f   :  { %v2041_v25 = vpop.eup %2040 }
 0x390   :  { %v1123_v28 = vmul.f32 %v2041_v25, %v2308_v50 }
 0x391   :  { %v2043_v26 = vpop.eup %2042 }
 0x392   :  { %v1277_v30 = vmul.f32 %v2043_v26, %v2312_v55 }
 0x393   :  { %v2045_v27 = vpop.eup %2044 }
 0x394   :  { %v1124_v4 = vmul.f32 %v2045_v27, %v2316_v59 }
 0x395   :  { %v2047_v29 = vpop.eup %2046 }
 0x396   :  { %v1684_v31 = vpack.c.bf16 %v1124_v4, %v1123_v28  ;;  %v1278_v32 = vmul.f32 %v2047_v29, %v2320_v62 }
 0x398   :  { %1685 = vst [vmem:[#allocation2] sm:$0xff] %v1684_v31   ;;  %v1689_v33 = vpack.c.bf16 %v1278_v32, %v1277_v30 }
 0x39a   :  { %1690 = vst [vmem:[#allocation2 + $0x8] sm:$0xff] %v1689_v33  }
 0x39f   :  { %v2022_v34 = vld [vmem:[#allocation2] sm:$0xff]  }
 0x3a0   :  { %1872 = vmatmul.mubr.bf16.vlgmr.msra.gmra.mxu1 %v2022_v34 }
 0x3a1   :  { %v2023_v35 = vld [vmem:[#allocation2 + $0x8] sm:$0xff]  }
 0x3a2   :  { %1892 = vmatmul.mubr.bf16.vlgmr.msra.gmra.mxu0 %v2023_v35 }
 0x460   :  { %v1396_v36 = vpop.f32.mrf.mxu1 }
 0x461   :  { %1403 = vst [vmem:[%s2362_s8] sm:$0xff] %v1396_v36 }
 0x462   :  { %v1873_v37 = vpop.f32.mrf.mxu1  ;;  %v1513_v38 = vpop.f32.mrf.mxu0 }
 0x463   :  { %1675 = vst [vmem:[%s2362_s8 + $0x10] sm:$0xff] %v1513_v38 }
 0x464   :  { %v1399_v39 = vpop.f32.mrf.mxu1  ;;  %v1893_v40 = vpop.f32.mrf.mxu0 }
 0x465   :  { %1404 = vst [vmem:[%s2362_s8 + $0x8] sm:$0xff] %v1399_v39 }
 0x466   :  { %v1874_v41 = vpop.f32.mrf.mxu1  ;;  %v1516_v42 = vpop.f32.mrf.mxu0 }
 0x467   :  { %1676 = vst [vmem:[%s2362_s8 + $0x18] sm:$0xff] %v1516_v42 }
 0x468   :  { %v1894_v43 = vpop.f32.mrf.mxu0 }
 0x469   :  { %1527 = vsyncpa [#allocation4], 1 }
 0x46a   :  { %1528 = vsyncpa [#allocation6], 1 }

</bundles_post_ra>
